<compile_context>
chip_gen: v6e
topology: v6e:2x2x1
jax: 0.10.0
libtpu: 0.0.40
codegen_flags: <defaults>
</compile_context>

<pallas_src>
import functools

import jax
import jax.numpy as jnp
from jax.experimental import pallas as pl
from jax.experimental.pallas import tpu as pltpu

_PAIRWISE_EPS = 1e-6   # torch.nn.functional.pairwise_distance default eps


# ---------------- fused, B-tiled Pallas kernel ----------------
def _contrastive_loss_kernel(o1_ref, o2_ref, lbl_ref, loss_ref, *, margin, n_rows):
    # o1/o2: (TB, D) native dtype, lbl: (TB, 1) native dtype, loss: (1, 1) f32.
    i = pl.program_id(0)
    tb = o1_ref.shape[0]

    @pl.when(i == 0)
    def _init():
        loss_ref[...] = jnp.zeros_like(loss_ref)

    # Upcast inside the kernel (inputs arrive over HBM in their native width).
    o1 = o1_ref[...].astype(jnp.float32)
    o2 = o2_ref[...].astype(jnp.float32)

    diff = o1 - o2 + _PAIRWISE_EPS                                # (TB, D)  VPU
    d2 = jnp.sum(diff * diff, axis=-1, keepdims=True)             # (TB, 1)  XLU reduce
    d = jnp.sqrt(d2)                                              # (TB, 1)  EUP
    lbl = lbl_ref[...].astype(jnp.float32)                        # (TB, 1)
    hinge = jnp.maximum(margin - d, 0.0)                          # clamp(margin-d, 0)
    # Reuse d2 for the similar-pair term (== torch's pow(sqrt(x),2) to ~1 ulp).
    per_pair = (1.0 - lbl) * d2 + lbl * (hinge * hinge)           # (TB, 1)

    # Mask rows of the (possibly padded) last tile that fall past the true B.
    row = i * tb + jax.lax.broadcasted_iota(jnp.int32, (tb, 1), 0)
    per_pair = jnp.where(row < n_rows, per_pair, 0.0)

    # Fold this tile into the resident (1,1) accumulator (output block).
    loss_ref[...] += jnp.sum(per_pair, axis=0, keepdims=True)

    @pl.when(i == pl.num_programs(0) - 1)
    def _finalize():
        loss_ref[...] = loss_ref[...] * (1.0 / n_rows)            # mean


# ---------------- wrapper ----------------
def contrastive_loss(output1, output2, label, margin=2.0, block_rows=None):
    """output1/output2: (B, D) float (any width), label: (B,) -> scalar f32 loss."""
    n, d_feat = output1.shape

    if block_rows is None:
        # Keep each input tile <= ~2 MiB so 2 inputs x 2 pipeline buffers fit the
        # default scoped-VMEM budget on every TPU generation (v5e/v6e/v7x).
        itemsize = jnp.dtype(output1.dtype).itemsize
        per_row_bytes = max(d_feat * itemsize, 1)
        tb = max(8, min(512, (2 * 1024 * 1024) // per_row_bytes))
        tb = (tb // 8) * 8
        block_rows = n if n <= tb else tb   # full-B block is always legal
    tb = block_rows

    grid = (pl.cdiv(n, tb),)
    lbl2 = label.reshape(n, 1)              # native dtype; cast happens in-kernel

    out = pl.pallas_call(
        functools.partial(_contrastive_loss_kernel,
                          margin=float(margin), n_rows=n),
        out_shape=jax.ShapeDtypeStruct((1, 1), jnp.float32),
        grid=grid,
        in_specs=[
            pl.BlockSpec((tb, d_feat), lambda i: (i, 0)),
            pl.BlockSpec((tb, d_feat), lambda i: (i, 0)),
            pl.BlockSpec((tb, 1), lambda i: (i, 0)),
        ],
        # Constant index map => output block stays VMEM-resident across the
        # reduction axis and serves as the accumulator.
        out_specs=pl.BlockSpec((1, 1), lambda i: (0, 0)),
        compiler_params=pltpu.CompilerParams(
            dimension_semantics=("arbitrary",)),
    )(output1, output2, lbl2)
    return out[0, 0]


# ---------------- pure-JAX reference (mirrors the torch forward) ----------------
def ref_contrastive_loss(output1, output2, label, margin=2.0):
    o1 = output1.astype(jnp.float32)
    o2 = output2.astype(jnp.float32)
    diff = o1 - o2 + _PAIRWISE_EPS
    d = jnp.sqrt(jnp.sum(diff * diff, axis=-1))                   # F.pairwise_distance
    lbl = label.astype(jnp.float32)
    return jnp.mean((1.0 - lbl) * d ** 2
                    + lbl * jnp.maximum(margin - d, 0.0) ** 2)


if __name__ == "__main__":
    MARGIN = 2.0
    key = jax.random.PRNGKey(0)

    # ---- check 1: f32 inputs, B not divisible by the tile -> exercises the
    #               multi-step grid, the accumulator and the last-tile masking.
    B, D = 20, 128
    k1, k2, k3, k4, k5 = jax.random.split(key, 5)
    out1 = jax.random.normal(k1, (B, D), dtype=jnp.float32)
    out2 = jax.random.normal(k2, (B, D), dtype=jnp.float32)
    label = jax.random.bernoulli(k3, 0.5, (B,)).astype(jnp.float32)

    loss_fn = jax.jit(functools.partial(contrastive_loss, margin=MARGIN,
                                        block_rows=8))
    loss = jax.block_until_ready(loss_fn(out1, out2, label))
    ref = jax.block_until_ready(ref_contrastive_loss(out1, out2, label, MARGIN))
    assert loss.shape == (), loss.shape
    assert bool(jnp.isfinite(loss))
    assert bool(jnp.allclose(loss, ref, rtol=1e-5, atol=1e-6)), (loss, ref)

    # ---- check 2: bf16 inputs streamed in native width, upcast in-kernel.
    B2, D2 = 64, 128
    o1b = jax.random.normal(k4, (B2, D2), dtype=jnp.float32).astype(jnp.bfloat16)
    o2b = jax.random.normal(k5, (B2, D2), dtype=jnp.float32).astype(jnp.bfloat16)
    lblb = jax.random.bernoulli(k3, 0.5, (B2,)).astype(jnp.float32)

    loss_fn_bf16 = jax.jit(functools.partial(contrastive_loss, margin=MARGIN))
    loss_b = jax.block_until_ready(loss_fn_bf16(o1b, o2b, lblb))
    ref_b = jax.block_until_ready(ref_contrastive_loss(o1b, o2b, lblb, MARGIN))
    assert bool(jnp.isfinite(loss_b))
    assert bool(jnp.allclose(loss_b, ref_b, rtol=1e-5, atol=1e-6)), (loss_b, ref_b)

    print("KERNEL_OK")
</pallas_src>

<mosaic_0001>
module attributes {stable_mosaic.version = 11 : i64} {
  func.func @_contrastive_loss_kernel(%arg0: i32, %arg1: memref<8x128xf32, #tpu.memory_space<vmem>>, %arg2: memref<8x128xf32, #tpu.memory_space<vmem>>, %arg3: memref<8x1xf32, #tpu.memory_space<vmem>>, %arg4: memref<1x1xf32, #tpu.memory_space<vmem>>) attributes {dimension_semantics = [#tpu.dimension_semantics<arbitrary>], iteration_bounds = array<i64: 3>, scalar_prefetch = 0 : i64, scratch_operands = 0 : i64, tpu.core_type = #tpu.core_type<tc>, window_params = [{transform_indices = @transform_0, window_bounds = array<i64: 8, 128>}, {transform_indices = @transform_1, window_bounds = array<i64: 8, 128>}, {transform_indices = @transform_2, window_bounds = array<i64: 8, 1>}, {pipeline_mode = #tpu.pipeline_mode<synchronous>, transform_indices = @transform_3, window_bounds = array<i64: 1, 1>}]} {
    %c0_i32 = arith.constant 0 : i32
    %0 = arith.cmpi eq, %arg0, %c0_i32 : i32
    %1 = arith.extui %0 : i1 to i32
    %c0_i32_0 = arith.constant 0 : i32
    %2 = arith.cmpi ne, %1, %c0_i32_0 : i32
    scf.if %2 {
      %cst_17 = arith.constant 0.000000e+00 : f32
      %39 = vector.broadcast %cst_17 : f32 to vector<1x1xf32>
      %c0_18 = arith.constant 0 : index
      %c0_19 = arith.constant 0 : index
      %40 = vector.load %arg4[%c0_18, %c0_19] : memref<1x1xf32, #tpu.memory_space<vmem>>, vector<1x1xf32>
      tpu.vector_store %arg4[%c0_18, %c0_19], %39 {strides = array<i32>} : memref<1x1xf32, #tpu.memory_space<vmem>>, vector<1x1xf32>,
    } else {
    }
    %c0 = arith.constant 0 : index
    %c0_1 = arith.constant 0 : index
    %3 = vector.load %arg1[%c0, %c0_1] : memref<8x128xf32, #tpu.memory_space<vmem>>, vector<8x128xf32>
    %c0_2 = arith.constant 0 : index
    %c0_3 = arith.constant 0 : index
    %4 = vector.load %arg2[%c0_2, %c0_3] : memref<8x128xf32, #tpu.memory_space<vmem>>, vector<8x128xf32>
    %5 = arith.subf %3, %4 : vector<8x128xf32>
    %cst = arith.constant 9.99999997E-7 : f32
    %6 = vector.broadcast %cst : f32 to vector<8x128xf32>
    %7 = arith.addf %5, %6 : vector<8x128xf32>
    %8 = arith.mulf %7, %7 : vector<8x128xf32>
    %cst_4 = arith.constant dense<0.000000e+00> : vector<8xf32>
    %9 = vector.multi_reduction <add>, %8, %cst_4 [1] : vector<8x128xf32> to vector<8xf32>
    %10 = vector.shape_cast %9 : vector<8xf32> to vector<8x1xf32>
    %11 = math.sqrt %10 : vector<8x1xf32>
    %c0_5 = arith.constant 0 : index
    %c0_6 = arith.constant 0 : index
    %12 = vector.load %arg3[%c0_5, %c0_6] : memref<8x1xf32, #tpu.memory_space<vmem>>, vector<8x1xf32>
    %cst_7 = arith.constant 2.000000e+00 : f32
    %13 = vector.broadcast %cst_7 : f32 to vector<8x1xf32>
    %14 = arith.subf %13, %11 : vector<8x1xf32>
    %cst_8 = arith.constant 0.000000e+00 : f32
    %15 = vector.broadcast %cst_8 : f32 to vector<8x1xf32>
    %16 = arith.maximumf %14, %15 : vector<8x1xf32>
    %cst_9 = arith.constant 1.000000e+00 : f32
    %17 = vector.broadcast %cst_9 : f32 to vector<8x1xf32>
    %18 = arith.subf %17, %12 : vector<8x1xf32>
    %19 = arith.mulf %18, %10 : vector<8x1xf32>
    %20 = arith.mulf %16, %16 : vector<8x1xf32>
    %21 = arith.mulf %12, %20 : vector<8x1xf32>
    %22 = arith.addf %19, %21 : vector<8x1xf32>
    %c8_i32 = arith.constant 8 : i32
    %23 = arith.muli %arg0, %c8_i32 : i32
    %24 = tpu.iota {dimensions = array<i32: 0>} : vector<8x1xi32>
    %25 = vector.broadcast %23 : i32 to vector<8x1xi32>
    %26 = arith.addi %25, %24 : vector<8x1xi32>
    %c20_i32 = arith.constant 20 : i32
    %27 = vector.broadcast %c20_i32 : i32 to vector<8x1xi32>
    %28 = arith.cmpi slt, %26, %27 : vector<8x1xi32>
    %cst_10 = arith.constant 0.000000e+00 : f32
    %29 = vector.broadcast %cst_10 : f32 to vector<8x1xf32>
    %30 = arith.select %28, %22, %29 : vector<8x1xi1>, vector<8x1xf32>
    %c0_11 = arith.constant 0 : index
    %c0_12 = arith.constant 0 : index
    %31 = vector.load %arg4[%c0_11, %c0_12] : memref<1x1xf32, #tpu.memory_space<vmem>>, vector<1x1xf32>
    %cst_13 = arith.constant dense<0.000000e+00> : vector<1xf32>
    %32 = vector.multi_reduction <add>, %30, %cst_13 [0] : vector<8x1xf32> to vector<1xf32>
    %33 = vector.shape_cast %32 : vector<1xf32> to vector<1x1xf32>
    %34 = arith.addf %31, %33 : vector<1x1xf32>
    %c0_14 = arith.constant 0 : index
    %c0_15 = arith.constant 0 : index
    %35 = vector.load %arg4[%c0_14, %c0_15] : memref<1x1xf32, #tpu.memory_space<vmem>>, vector<1x1xf32>
    tpu.vector_store %arg4[%c0_14, %c0_15], %34 {strides = array<i32>} : memref<1x1xf32, #tpu.memory_space<vmem>>, vector<1x1xf32>,
    %c2_i32 = arith.constant 2 : i32
    %36 = arith.cmpi eq, %arg0, %c2_i32 : i32
    %37 = arith.extui %36 : i1 to i32
    %c0_i32_16 = arith.constant 0 : i32
    %38 = arith.cmpi ne, %37, %c0_i32_16 : i32
    scf.if %38 {
      %c0_17 = arith.constant 0 : index
      %c0_18 = arith.constant 0 : index
      %39 = vector.load %arg4[%c0_17, %c0_18] : memref<1x1xf32, #tpu.memory_space<vmem>>, vector<1x1xf32>
      %cst_19 = arith.constant 5.000000e-02 : f32
      %40 = vector.broadcast %cst_19 : f32 to vector<1x1xf32>
      %41 = arith.mulf %39, %40 : vector<1x1xf32>
      %c0_20 = arith.constant 0 : index
      %c0_21 = arith.constant 0 : index
      %42 = vector.load %arg4[%c0_20, %c0_21] : memref<1x1xf32, #tpu.memory_space<vmem>>, vector<1x1xf32>
      tpu.vector_store %arg4[%c0_20, %c0_21], %41 {strides = array<i32>} : memref<1x1xf32, #tpu.memory_space<vmem>>, vector<1x1xf32>,
    } else {
    }
    return
  }
  func.func @transform_0(%arg0: i32) -> (i32, i32) {
    %c0_i32 = arith.constant 0 : i32
    %c0_i32_0 = arith.constant 0 : i32
    return %arg0, %c0_i32 : i32, i32
  }
  func.func @transform_1(%arg0: i32) -> (i32, i32) {
    %c0_i32 = arith.constant 0 : i32
    %c0_i32_0 = arith.constant 0 : i32
    return %arg0, %c0_i32 : i32, i32
  }
  func.func @transform_2(%arg0: i32) -> (i32, i32) {
    %c0_i32 = arith.constant 0 : i32
    %c0_i32_0 = arith.constant 0 : i32
    return %arg0, %c0_i32 : i32, i32
  }
  func.func @transform_3(%arg0: i32) -> (i32, i32) {
    %c0_i32 = arith.constant 0 : i32
    %c0_i32_0 = arith.constant 0 : i32
    %c0_i32_1 = arith.constant 0 : i32
    return %c0_i32, %c0_i32_0 : i32, i32
  }
}

</mosaic_0001>

<bundles_post_ra>
// kernel: contrastive_loss.1
= control target key start
LH: loop header
LB: loop body
LE: loop exit
PB: predicated region body
PF: predicated region fallthrough
CT: control target
= control target key end

     0   :  { %8 = vsyncpa [#allocation3], 0  ;;  %s641_s0 = inlined_call_operand.vmem [shape: f32[20,128], index: 0, kind: input, shape index: {}]   ;;  %s642_s1 = inlined_call_operand.hbm [shape: f32[20,128], index: 1, kind: input, shape index: {}]   ;;  %s643_s2 = inlined_call_operand.vmem [shape: f32[20,1], index: 2, kind: input, shape index: {}]   ;;  %s644_s3 = inlined_call_operand.hbm [shape: f32[1,1], index: 3, kind: output, shape index: {}]  }
   0x1   :  { %10 = vsyncpa [#allocation3 + $0x1], 0 }
   0x2   :  { %11 = vsyncpa [#allocation4], 0  ;;  %s523_s12 = smov 0   ;;  %s525_s13 = smov 0  }
   0x3   :  { %s527_s14 = smov 0   ;;  %s529_s15 = smov 0  }
   0x4 LB: > { %s542_s16 = sadd.s32 4294967295, %s498_s15   ;;  %s545_s17 = sadd.s32 1, %s498_s15   ;;  %s498_s15 = sphi %s529_s15, %s654_s15   ;;  %s494_s14 = sphi %s527_s14, %s653_s14   ;;  %s490_s13 = sphi %s525_s13, %s652_s13   ;;  %s486_s12 = sphi %s523_s12, %s651_s12  }
   0x5   : > { %s47_s18 = ssub.s32 %s498_s15, %s545_s17  ;;  %s50_s19 = sadd.s32 1, %s494_s14 }
   0x6   : > { %p48_p0 = scmp.eq.s32.totalorder %s47_s18, 0  ;;  %p57_p1 = scmp.ne.s32.totalorder %s494_s14, %s490_s13 }
   0x7   : > { %p58_p2 = scmp.eq.s32.totalorder %s498_s15, 0  ;;  %p63_p3 = scmp.ne.s32.totalorder %s490_s13, %s486_s12 }
   0x8   : > { %s555_s20 = scalar_select %p48_p0, %s494_s14, %s50_s19  }
   0x9   : > { %p59_p4 = por %p58_p2, %p57_p1  ;;  %p64_p5 = scmp.eq.s32.totalorder %s542_s16, 0 }
   0xa   : > { %p369_p6 = scmp.lt.s32.totalorder %s498_s15, 3  ;;  %s141_s22 = sand.u32 1, %s494_s14  }
   0xb   : > { %p559_p7 = por %p64_p5, %p63_p3  ;;  %s346_s23 = sshll.u32 %s141_s22, 3 }
   0xc   : > { %s347_s24 = sshll.u32 %s498_s15, 7  ;;  %s145_s28 = scalar_lea.vmem [#allocation2], %s346_s23 }
   0xd   : > { %s646_s21 = scalar_select %p559_p7, 1, 0 }
   0xe   : > { %s568_s27 = scalar_lea.hbm %s642_s1, %s347_s24  ;;  %s152_s29 = sshll.u32 %s145_s28, 4  ;;  %s570_s29 = int_to_ptr.vmem [resolvable:$true] %s152_s29 }
   0xf   : > { %p572_p8 = pnand %p369_p6, %p59_p4  ;;  %s142_s4 = scalar_lea.sflag [#allocation3], %s141_s22 }
  0x10   : > { %s408_s5 = scalar_lea.hbm %s568_s27, 128  ;;  %s413_s8 = scalar_lea.hbm %s642_s1, 384 }
  0x11   : > { %p409_p11 = scmp.ne.s32.totalorder %s568_s27, %s408_s5  ;;  %p410_p12 = pneg %p572_p8 }
  0x12   : > { %p414_p1 = scmp.lt.s32.totalorder %s568_s27, %s642_s1  ;;  %p415_p2 = scmp.lt.s32.totalorder %s413_s8, %s408_s5 }
  0x13   : > { %p411_p13 = pnand %p410_p12, %p409_p11 }
  0x14   : > { %p416_p3 = por %p415_p2, %p414_p1 }
  0x15   : > { %p412_p0 = pneg %p411_p13 }
  0x17   : > { %p417_p4 = pnand %p416_p3, %p412_p0 }
  0x19   : > { %420 = shalt.err (!%p417_p4)
}
  0x1a   : > { %s421_s11 = scalar_lea.vmem %s570_s29, 128  ;;  %s500_s12 = smov [#allocation2]  }
  0x1b   : > { %p422_p5 = scmp.ne.s32.totalorder %s570_s29, %s421_s11  ;;  %s426_s18 = sshll.u32 %s500_s12, 4  ;;  %s427_s18 = int_to_ptr.vmem [resolvable:$false] %s426_s18 }
  0x1c   : > { %s428_s19 = scalar_lea.vmem %s427_s18, 256  ;;  %p429_p13 = scmp.lt.s32.totalorder %s570_s29, %s427_s18 }
  0x1d   : > { %p424_p6 = pnand %p422_p5, %p410_p12  ;;  %p430_p9 = scmp.lt.s32.totalorder %s428_s19, %s421_s11 }
  0x1f   : > { %p425_p11 = pneg %p424_p6  ;;  %p431_p10 = por %p430_p9, %p429_p13 }
  0x21   : > { %p432_p7 = pnand %p431_p10, %p425_p11 }
  0x23   : > { %435 = shalt.err (!%p432_p7)
}
  0x24   : > { %368 = dma.hbm_to_vmem [thread:$0]  (!%p572_p8), %s568_s27, 128, %s570_s29, %s142_s4  }
  0x25   : > { %p648_p0 = scmp.lt.s32.totalorder %s498_s15, 4  ;;  %p649_p1 = scmp.ge.s32.totalorder %s498_s15, 1 }
  0x27   : > { %p165_p12 = pnand %p649_p1, %p648_p0 }
  0x28   : > { %s170_s22 = sand.u32 (!%p165_p12), 1, %s490_s13   ;;  %p650_p9 = scmp.ne.s32.totalorder (!%p165_p12), %s646_s21, 0 }
  0x29   : > { %168 = sbr.rel (%p165_p12) target bundleno = 273 (0x111), region = 32  ;;  %s349_s23 = sshll.u32 (!%p165_p12), %s170_s22, 3 }
  0x2a   : > { %s171_s24 = scalar_lea.sflag (!%p165_p12), [#allocation3], %s170_s22  ;;  %s174_s25 = scalar_lea.vmem (!%p165_p12), [#allocation2], %s349_s23 }
  0x2e   : > { %477 = dma.done.wait (%p650_p9), %s171_s24, 128  }
  0x2f   : > { %479 = vsyncadd (%p650_p9), %s171_s24, 4294967168  ;;  %p200_p7 = scmp.lt.s32.totalorder %s542_s16, 2  ;;  %p352_p8 = scmp.ne.s32.totalorder %s542_s16, 0 }
  0x31   : > { %s201_s26 = scalar_select %p200_p7, %s542_s16, 2 }
  0x32   : > { %211 = sbr.rel (%p352_p8) target bundleno = 57 (0x39), region = 40 }
  0x33   : > { %s350_s27 = sshll.u32 %s201_s26, 3 }
  0x34   : > { %s203_s29 = scalar_lea.vmem %s641_s0, %s350_s27  ;;  %s207_s5 = scalar_lea.vmem %s643_s2, %s350_s27 }
  0x37   : > { %vm212_vm0 = vcmask 0   ;;  %v501_v0 = vmov 0.0  }
  0x38   : > { %213 = vst.msk [vmem:[#allocation5] sm:$0x1] %vm212_vm0, %v501_v0 }
  0x39 PF: > { %v214_v1 = vld [vmem:[%s203_s29] sm:$0xff]  ;;  %v237_v8 = vlaneseq  ;;  %s353_s21 = sshll.u32 %s542_s16, 3  ;;  %vm244_vm4 = vcmask 7168   ;;  %vm253_vm5 = vcmask 0   ;;  %p354_p10 = scmp.ne.s32.totalorder %s542_s16, 2 }
  0x3a   : > { %v215_v2 = vld [vmem:[%s174_s25] sm:$0xff]  ;;  %v239_v16 = vstv %s353_s21 }
  0x3b   : > { %v216_v3 = vsub.f32 %v214_v1, %v215_v2  ;;  %v228_v13 = vld [vmem:[%s207_s5] sm:$0xff]  ;;  %v238_v14 = vshrl.u32 %v237_v8, 7 }
  0x3c   : > { %v231_v18 = vsub.f32 1.0, %v228_v13 }
  0x3d   : > { %v217_v4 = vadd.f32 1e-06, %v216_v3  ;;  %v240_v19 = vadd.s32 %v239_v16, %v238_v14 }
  0x3f   : > { %v218_v5 = vmul.f32 %v217_v4, %v217_v4  ;;  %vm241_vm3 = vcmp.lt.s32.totalorder %v240_v19, 20  ;;  %v243_v31 = vld [vmem:[#allocation5] sm:$0x1] }
  0x41   : > { %219 = vadd.xlane.f32.xlu0 %v218_v5 }
  0xca   : > { %v220_v6 = vpop.xlane.xlu0 %219 }
  0xcb   : > { %406 = vrsqrt.f32 %v220_v6  ;;  %vm223_vm1 = vcmp.eq.f32.partialorder %v220_v6, inf  ;;  %v226_v10 = vand.u32 2147483648, %v220_v6  ;;  %vm225_vm2 = vcmp.eq.f32.partialorder %v220_v6, 0.0 }
  0xcc   : > { %v232_v21 = vmul.f32 %v231_v18, %v220_v6 }
  0xd8   : > { %v407_v7 = vpop.eup %406 }
  0xd9   : > { %v222_v9 = vmul.f32 %v407_v7, %v220_v6 }
  0xdb   : > { %v224_v11 = vsel %vm223_vm1, %v220_v6, %v222_v9 }
  0xdc   : > { %v227_v12 = vsel %vm225_vm2, %v226_v10, %v224_v11 }
  0xdd   : > { %v229_v15 = vsub.f32 2.0, %v227_v12 }
  0xdf   : > { %v230_v17 = vmax.f32 %v229_v15, 0.0 }
  0xe1   : > { %v233_v20 = vmul.f32 %v230_v17, %v230_v17 }
  0xe3   : > { %v234_v22 = vmul.f32 %v233_v20, %v228_v13 }
  0xe5   : > { %v235_v23 = vadd.f32 %v234_v22, %v232_v21 }
  0xe7   : > { %v242_v24 = vsel %vm241_vm3, %v235_v23, 0.0 }
  0xe8   : > { %v245_v25 = vsel %vm244_vm4, %v242_v24, 0.0 }
  0xe9   : > { %v246_v26 = vrot.slane %v245_v25, 4 }
  0xeb   : > { %v247_v27 = vadd.f32 %v246_v26, %v245_v25 }
  0xed   : > { %v248_v28 = vrot.slane %v247_v27, 2 }
  0xef   : > { %v249_v29 = vadd.f32 %v248_v28, %v247_v27 }
  0xf1   : > { %v250_v30 = vrot.slane %v249_v29, 1 }
  0xf3   : > { %v251_v32 = vadd.f32 %v250_v30, %v249_v29  ;;  %258 = sbr.rel (%p354_p10) target bundleno = 258 (0x102), region = 44 }
  0xf5   : > { %v252_v33 = vadd.f32 %v251_v32, %v243_v31 }
  0xf7   : > { %254 = vst.msk [vmem:[#allocation5] sm:$0x1] %vm253_vm5, %v252_v33 }
  0xfe   : > { %v259_v34 = vld [vmem:[#allocation5] sm:$0x1] }
  0xff   : > { %v260_v35 = vmul.f32 0.05, %v259_v34 }
 0x101   : > { %261 = vst.msk [vmem:[#allocation5] sm:$0x1] %vm253_vm5, %v260_v35 }
 0x102 PF: > { %p370_p2 = scmp.eq.s32.totalorder %s542_s16, 2  ;;  %s502_s6 = smov [#allocation5]  }
 0x103   : > { %s269_s7 = sshll.u32 %s502_s6, 4  ;;  %s270_s7 = int_to_ptr.vmem [resolvable:$true] %s269_s7 }
 0x104   : > { %s436_s8 = scalar_lea.vmem %s270_s7, 16  ;;  %s442_s9 = scalar_lea.vmem %s270_s7, 32 }
 0x105   : > { %p437_p3 = scmp.ne.s32.totalorder %s270_s7, %s436_s8  ;;  %p443_p6 = scmp.lt.s32.totalorder %s270_s7, %s270_s7 }
 0x106   : > { %p444_p11 = scmp.lt.s32.totalorder %s442_s9, %s436_s8 }
 0x107   : > { %p438_p4 = pnand %p437_p3, %p370_p2 }
 0x108   : > { %p445_p13 = por %p444_p11, %p443_p6 }
 0x109   : > { %p439_p5 = pneg %p438_p4 }
 0x10b   : > { %p446_p0 = pnand %p445_p13, %p439_p5 }
 0x10d   : > { %449 = shalt.err (!%p446_p0)
}
 0x10e   : > { %362 = dma.vmem_to_hbm [thread:$0]  (%p370_p2), %s270_s7, 16, %s644_s3, [#allocation4]  }
 0x10f   : > { %481 = dma.done.wait (%p370_p2), [#allocation4], 16  }
 0x110   : > { %483 = vsyncadd (%p370_p2), [#allocation4], 4294967280 }
 0x111 PF: > { %p14_p1 = scmp.ge.s32.totalorder %s545_s17, 5   ;;  %s651_s12 = smov %s490_s13 }
 0x112   : > { %s652_s13 = smov %s494_s14  ;;  %s653_s14 = smov %s555_s20 }
 0x113   : > { %s654_s15 = smov %s545_s17  ;;  %16 = sbr.rel (!%p14_p1) target bundleno = 4 (0x4), region = 83 }
 0x118   :  { %282 = vsyncpa [#allocation3], 1 }
 0x119   :  { %284 = vsyncpa [#allocation3 + $0x1], 1 }
 0x11a   :  { %285 = vsyncpa [#allocation4], 1 }
 0x11b   :  { %287 = vsyncpa [#allocation4 + $0x1], 1 }

</bundles_post_ra>
